<compile_context>
chip_gen: v7x
topology: tpu7x:2x2x1
jax: 0.10.0
libtpu: 0.0.40
codegen_flags: <defaults>
</compile_context>

<pallas_src>
import math
from functools import partial

import jax
import jax.numpy as jnp
from jax.experimental import pallas as pl
from jax.experimental.pallas import tpu as pltpu


def _round_up(n, m):
    return ((n + m - 1) // m) * m


# ----------------------------- kernel -----------------------------

def _selective_param_kernel(
    x_ref, ln_g_ref, ln_b_ref, w_in_ref, b_in_ref,
    w_main_ref, b_main_ref, w_uv_ref, b_uv_ref,
    out_ref,
    *, s2, rank, au_w,
):
    x = x_ref[...].astype(jnp.float32)

    # --- LayerNorm (eps=1e-5, biased variance — matches nn.LayerNorm) ---
    mean = jnp.mean(x, axis=-1, keepdims=True)
    var = jnp.mean(jnp.square(x - mean), axis=-1, keepdims=True)
    xn = (x - mean) * jax.lax.rsqrt(var + 1e-5)
    xn = xn * ln_g_ref[...] + ln_b_ref[...]

    # --- input projection + exact GELU (nn.GELU() default = erf form) ---
    h = jnp.dot(xn, w_in_ref[...], preferred_element_type=jnp.float32) + b_in_ref[...]
    h = 0.5 * h * (1.0 + jax.lax.erf(h * (1.0 / math.sqrt(2.0))))

    # --- fused main projection: columns == final output slab layout ---
    #     [A_diag(S*S, diag-embedded) | B | C | D | zero-pad]
    out_ref[...] = (
        jnp.dot(h, w_main_ref[...], preferred_element_type=jnp.float32)
        + b_main_ref[...]
    )

    # --- fused low-rank factors: [AU_expanded(au_w) | AV_expanded(au_w)] ---
    # AU/AV were column-expanded host-side so that, per rank r, the outer
    # product A_U[:,i,r] * A_V[:,r,j] is a plain elementwise product of two
    # lane-dense (tile_m, S*S) blocks.
    uv = jnp.dot(h, w_uv_ref[...], preferred_element_type=jnp.float32) + b_uv_ref[...]
    prod = uv[:, : rank * s2] * uv[:, au_w: au_w + rank * s2]

    a = out_ref[:, :s2]                       # diag contribution already there
    for r in range(rank):                     # rank is small & static
        a = a + prod[:, r * s2:(r + 1) * s2]
    out_ref[:, :s2] = a


# ------------------- host-side weight fusion / expansion -------------------

def _build_fused_weights(p, *, state_dim, hidden_dim, rank):
    S, Hd, R = state_dim, hidden_dim, rank
    S2 = S * S
    out_main = S2 + S * Hd + Hd * S + Hd * Hd
    out_pad = _round_up(out_main, 128)        # lane-dense output slab width
    au_w = _round_up(R * S2, 128)             # per-factor expanded width

    eye = jnp.eye(S, dtype=jnp.float32)

    def diag_expand(m):                       # (rows, S) -> (rows, S*S), diag-embedded
        return (m[:, :, None] * eye[None, :, :]).reshape(m.shape[0], S2)

    def au_expand(m):                         # (rows, S*R), col = i*R + r
        t = m.reshape(m.shape[0], S, R).transpose(0, 2, 1)          # [., r, i]
        t = jnp.broadcast_to(t[:, :, :, None], (m.shape[0], R, S, S))
        t = t.reshape(m.shape[0], R * S2)                           # col r*S2+i*S+j
        return jnp.pad(t, ((0, 0), (0, au_w - R * S2)))

    def av_expand(m):                         # (rows, R*S), col = r*S + j
        t = m.reshape(m.shape[0], R, S)                             # [., r, j]
        t = jnp.broadcast_to(t[:, :, None, :], (m.shape[0], R, S, S))
        t = t.reshape(m.shape[0], R * S2)                           # col r*S2+i*S+j
        return jnp.pad(t, ((0, 0), (0, au_w - R * S2)))

    def main_fuse(ad, b, c, d):
        m = jnp.concatenate([diag_expand(ad), b, c, d], axis=1)
        return jnp.pad(m, ((0, 0), (0, out_pad - out_main)))

    w_main = main_fuse(p["w_ad"], p["w_b"], p["w_c"], p["w_d"])
    b_main = main_fuse(p["b_ad"], p["b_b"], p["b_c"], p["b_d"])
    w_uv = jnp.concatenate([au_expand(p["w_au"]), av_expand(p["w_av"])], axis=1)
    b_uv = jnp.concatenate([au_expand(p["b_au"]), av_expand(p["b_av"])], axis=1)
    return w_main, b_main, w_uv, b_uv, out_pad, au_w


# ----------------------------- wrapper -----------------------------

def low_rank_selective_param(x, p, *, state_dim, hidden_dim, rank, tile_m=256):
    batch, seq, input_dim = x.shape
    S, Hd = state_dim, hidden_dim
    S2 = S * S
    M = batch * seq

    # Large-M tiles (clamped for tiny inputs); ragged M handled via zero-pad.
    tile_m = _round_up(max(8, min(tile_m, _round_up(M, 8))), 8)
    M_pad = _round_up(M, tile_m)
    x2 = x.reshape(M, input_dim).astype(jnp.float32)
    if M_pad != M:
        x2 = jnp.pad(x2, ((0, M_pad - M), (0, 0)))

    w_main, b_main, w_uv, b_uv, out_pad, au_w = _build_fused_weights(
        p, state_dim=S, hidden_dim=Hd, rank=rank)

    weight_args = (p["ln_g"], p["ln_b"], p["w_in"], p["b_in"],
                   w_main, b_main, w_uv, b_uv)

    full = lambda arr: pl.BlockSpec(arr.shape, lambda i, _nd=arr.ndim: (0,) * _nd)
    row_spec = lambda ncols: pl.BlockSpec((tile_m, ncols), lambda i: (i, 0))

    grid_spec = pltpu.PrefetchScalarGridSpec(
        num_scalar_prefetch=0,
        grid=(M_pad // tile_m,),
        in_specs=[row_spec(input_dim)] + [full(w) for w in weight_args],
        out_specs=row_spec(out_pad),
    )

    # VMEM budget: double-buffered weights + in/out tiles + intermediates.
    weight_bytes = sum(int(w.size) * 4 for w in weight_args)
    io_tile_bytes = tile_m * (input_dim + out_pad) * 4
    inter_bytes = tile_m * (hidden_dim + 4 * au_w + 2 * input_dim + 2 * S2) * 4
    vmem_need = 2 * (weight_bytes + io_tile_bytes) + inter_bytes
    vmem_limit = int(max(32 * 1024 * 1024,
                         min(1.5 * vmem_need + (2 << 20), 96 * 1024 * 1024)))

    slab = pl.pallas_call(
        partial(_selective_param_kernel, s2=S2, rank=rank, au_w=au_w),
        out_shape=jax.ShapeDtypeStruct((M_pad, out_pad), jnp.float32),
        grid_spec=grid_spec,
        compiler_params=pltpu.CompilerParams(
            dimension_semantics=("parallel",),   # shards across TCs on v7x
            vmem_limit_bytes=vmem_limit,
        ),
    )(x2, *weight_args)

    slab = slab[:M]
    o = 0
    a_f = slab[:, o:o + S2];        o += S2
    b_f = slab[:, o:o + S * Hd];    o += S * Hd
    c_f = slab[:, o:o + Hd * S];    o += Hd * S
    d_f = slab[:, o:o + Hd * Hd]

    return {
        "A": a_f.reshape(batch, seq, S, S),
        "B": b_f.reshape(batch, seq, S, Hd),
        "C": c_f.reshape(batch, seq, Hd, S),
        "D": d_f.reshape(batch, seq, Hd, Hd),
    }


# ------------------------ deterministic params ------------------------

def init_params(key, input_dim, hidden_dim, state_dim, rank, init_scale=0.01):
    ks = jax.random.split(key, 8)

    def xavier(k, fan_in, fan_out, gain):
        lim = gain * math.sqrt(6.0 / (fan_in + fan_out))
        # stored as (in, out) == PyTorch weight.T so the kernel does h @ W
        return jax.random.uniform(k, (fan_in, fan_out), jnp.float32, -lim, lim)

    lim_in = 1.0 / math.sqrt(input_dim)
    return {
        "ln_g": jnp.ones((1, input_dim), jnp.float32),
        "ln_b": jnp.zeros((1, input_dim), jnp.float32),
        "w_in": jax.random.uniform(ks[0], (input_dim, hidden_dim), jnp.float32,
                                   -lim_in, lim_in),
        "b_in": jax.random.uniform(ks[1], (1, hidden_dim), jnp.float32,
                                   -lim_in, lim_in),
        "w_au": xavier(ks[2], hidden_dim, state_dim * rank, init_scale),
        "b_au": jnp.zeros((1, state_dim * rank), jnp.float32),
        "w_av": xavier(ks[3], hidden_dim, rank * state_dim, init_scale),
        "b_av": jnp.zeros((1, rank * state_dim), jnp.float32),
        "w_ad": xavier(ks[4], hidden_dim, state_dim, init_scale),
        "b_ad": jnp.zeros((1, state_dim), jnp.float32),
        "w_b": xavier(ks[5], hidden_dim, state_dim * hidden_dim, init_scale),
        "b_b": jnp.zeros((1, state_dim * hidden_dim), jnp.float32),
        "w_c": xavier(ks[6], hidden_dim, hidden_dim * state_dim, init_scale),
        "b_c": jnp.zeros((1, hidden_dim * state_dim), jnp.float32),
        "w_d": xavier(ks[7], hidden_dim, hidden_dim * hidden_dim, init_scale),
        "b_d": jnp.zeros((1, hidden_dim * hidden_dim), jnp.float32),
    }


# --------------------------- pure-JAX reference ---------------------------

def reference(x, p, *, state_dim, hidden_dim, rank):
    batch, seq, _ = x.shape
    mean = jnp.mean(x, axis=-1, keepdims=True)
    var = jnp.mean(jnp.square(x - mean), axis=-1, keepdims=True)
    xn = (x - mean) / jnp.sqrt(var + 1e-5) * p["ln_g"][0] + p["ln_b"][0]
    h = xn @ p["w_in"] + p["b_in"][0]
    h = 0.5 * h * (1.0 + jax.lax.erf(h / math.sqrt(2.0)))

    a_u = (h @ p["w_au"] + p["b_au"][0]).reshape(batch, seq, state_dim, rank)
    a_v = (h @ p["w_av"] + p["b_av"][0]).reshape(batch, seq, rank, state_dim)
    a_d = (h @ p["w_ad"] + p["b_ad"][0]).reshape(batch, seq, state_dim)
    A = jnp.matmul(a_u, a_v)
    A = A + a_d[..., None] * jnp.eye(state_dim, dtype=jnp.float32)
    B = (h @ p["w_b"] + p["b_b"][0]).reshape(batch, seq, state_dim, hidden_dim)
    C = (h @ p["w_c"] + p["b_c"][0]).reshape(batch, seq, hidden_dim, state_dim)
    D = (h @ p["w_d"] + p["b_d"][0]).reshape(batch, seq, hidden_dim, hidden_dim)
    return {"A": A, "B": B, "C": C, "D": D}


# --------------------------------- main ---------------------------------

if __name__ == "__main__":
    batch, seq = 2, 8
    input_dim, hidden_dim, state_dim, rank = 16, 32, 8, 4

    key = jax.random.PRNGKey(0)
    kx, kp = jax.random.split(key)
    x = jax.random.normal(kx, (batch, seq, input_dim), jnp.float32)
    params = init_params(kp, input_dim, hidden_dim, state_dim, rank)

    out = low_rank_selective_param(
        x, params, state_dim=state_dim, hidden_dim=hidden_dim, rank=rank)
    jax.block_until_ready(out)

    ref = reference(x, params, state_dim=state_dim, hidden_dim=hidden_dim, rank=rank)
    for name in ("A", "B", "C", "D"):
        assert out[name].shape == ref[name].shape, name
        assert jnp.allclose(out[name], ref[name], atol=1e-5, rtol=1e-4), name

    print("KERNEL_OK")
</pallas_src>

<mosaic_0001>
module attributes {stable_mosaic.version = 11 : i64} {
  func.func @_selective_param_kernel(%arg0: i32, %arg1: memref<16x16xf32, #tpu.memory_space<vmem>>, %arg2: memref<1x16xf32, #tpu.memory_space<vmem>>, %arg3: memref<1x16xf32, #tpu.memory_space<vmem>>, %arg4: memref<16x32xf32, #tpu.memory_space<vmem>>, %arg5: memref<1x32xf32, #tpu.memory_space<vmem>>, %arg6: memref<32x1664xf32, #tpu.memory_space<vmem>>, %arg7: memref<1x1664xf32, #tpu.memory_space<vmem>>, %arg8: memref<32x512xf32, #tpu.memory_space<vmem>>, %arg9: memref<1x512xf32, #tpu.memory_space<vmem>>, %arg10: memref<16x1664xf32, #tpu.memory_space<vmem>>) attributes {dimension_semantics = [#tpu.dimension_semantics<parallel>], iteration_bounds = array<i64: 1>, scalar_prefetch = 0 : i64, scratch_operands = 0 : i64, tpu.core_type = #tpu.core_type<tc>, window_params = [{transform_indices = @transform_0, window_bounds = array<i64: 16, 16>}, {pipeline_mode = #tpu.pipeline_mode<synchronous>, transform_indices = @transform_1, window_bounds = array<i64: 1, 16>}, {pipeline_mode = #tpu.pipeline_mode<synchronous>, transform_indices = @transform_2, window_bounds = array<i64: 1, 16>}, {pipeline_mode = #tpu.pipeline_mode<synchronous>, transform_indices = @transform_3, window_bounds = array<i64: 16, 32>}, {pipeline_mode = #tpu.pipeline_mode<synchronous>, transform_indices = @transform_4, window_bounds = array<i64: 1, 32>}, {pipeline_mode = #tpu.pipeline_mode<synchronous>, transform_indices = @transform_5, window_bounds = array<i64: 32, 1664>}, {pipeline_mode = #tpu.pipeline_mode<synchronous>, transform_indices = @transform_6, window_bounds = array<i64: 1, 1664>}, {pipeline_mode = #tpu.pipeline_mode<synchronous>, transform_indices = @transform_7, window_bounds = array<i64: 32, 512>}, {pipeline_mode = #tpu.pipeline_mode<synchronous>, transform_indices = @transform_8, window_bounds = array<i64: 1, 512>}, {transform_indices = @transform_9, window_bounds = array<i64: 16, 1664>}]} {
    %c0 = arith.constant 0 : index
    %c0_0 = arith.constant 0 : index
    %0 = vector.load %arg1[%c0, %c0_0] : memref<16x16xf32, #tpu.memory_space<vmem>>, vector<16x16xf32>
    %cst = arith.constant dense<0.000000e+00> : vector<16xf32>
    %1 = vector.multi_reduction <add>, %0, %cst [1] : vector<16x16xf32> to vector<16xf32>
    %2 = vector.shape_cast %1 : vector<16xf32> to vector<16x1xf32>
    %cst_1 = arith.constant 1.600000e+01 : f32
    %3 = vector.broadcast %cst_1 : f32 to vector<16x1xf32>
    %4 = arith.divf %2, %3 : vector<16x1xf32>
    %5 = vector.broadcast %4 : vector<16x1xf32> to vector<16x16xf32>
    %6 = arith.subf %0, %5 : vector<16x16xf32>
    %7 = arith.mulf %6, %6 : vector<16x16xf32>
    %cst_2 = arith.constant dense<0.000000e+00> : vector<16xf32>
    %8 = vector.multi_reduction <add>, %7, %cst_2 [1] : vector<16x16xf32> to vector<16xf32>
    %9 = vector.shape_cast %8 : vector<16xf32> to vector<16x1xf32>
    %cst_3 = arith.constant 1.600000e+01 : f32
    %10 = vector.broadcast %cst_3 : f32 to vector<16x1xf32>
    %11 = arith.divf %9, %10 : vector<16x1xf32>
    %12 = vector.broadcast %4 : vector<16x1xf32> to vector<16x16xf32>
    %13 = arith.subf %0, %12 : vector<16x16xf32>
    %cst_4 = arith.constant 9.99999974E-6 : f32
    %14 = vector.broadcast %cst_4 : f32 to vector<16x1xf32>
    %15 = arith.addf %11, %14 : vector<16x1xf32>
    %16 = math.rsqrt %15 : vector<16x1xf32>
    %17 = vector.broadcast %16 : vector<16x1xf32> to vector<16x16xf32>
    %18 = arith.mulf %13, %17 : vector<16x16xf32>
    %c0_5 = arith.constant 0 : index
    %c0_6 = arith.constant 0 : index
    %19 = vector.load %arg2[%c0_5, %c0_6] : memref<1x16xf32, #tpu.memory_space<vmem>>, vector<1x16xf32>
    %20 = vector.broadcast %19 : vector<1x16xf32> to vector<16x16xf32>
    %21 = arith.mulf %18, %20 : vector<16x16xf32>
    %c0_7 = arith.constant 0 : index
    %c0_8 = arith.constant 0 : index
    %22 = vector.load %arg3[%c0_7, %c0_8] : memref<1x16xf32, #tpu.memory_space<vmem>>, vector<1x16xf32>
    %23 = vector.broadcast %22 : vector<1x16xf32> to vector<16x16xf32>
    %24 = arith.addf %21, %23 : vector<16x16xf32>
    %c0_9 = arith.constant 0 : index
    %c0_10 = arith.constant 0 : index
    %25 = vector.load %arg4[%c0_9, %c0_10] : memref<16x32xf32, #tpu.memory_space<vmem>>, vector<16x32xf32>
    %cst_11 = arith.constant dense<0.000000e+00> : vector<16x32xf32>
    %26 = tpu.matmul %24, %25, %cst_11 {dimension_numbers = #tpu.dot_dimension_numbers<[1], [0], [0], [1], [0, 0, 1, 1], [], []>} : vector<16x16xf32>, vector<16x32xf32>, vector<16x32xf32> -> vector<16x32xf32>
    %c0_12 = arith.constant 0 : index
    %c0_13 = arith.constant 0 : index
    %27 = vector.load %arg5[%c0_12, %c0_13] : memref<1x32xf32, #tpu.memory_space<vmem>>, vector<1x32xf32>
    %28 = vector.broadcast %27 : vector<1x32xf32> to vector<16x32xf32>
    %29 = arith.addf %26, %28 : vector<16x32xf32>
    %cst_14 = arith.constant 5.000000e-01 : f32
    %30 = vector.broadcast %cst_14 : f32 to vector<16x32xf32>
    %31 = arith.mulf %30, %29 : vector<16x32xf32>
    %cst_15 = arith.constant 0.707106769 : f32
    %32 = vector.broadcast %cst_15 : f32 to vector<16x32xf32>
    %33 = arith.mulf %29, %32 : vector<16x32xf32>
    %34 = math.erf %33 : vector<16x32xf32>
    %cst_16 = arith.constant 1.000000e+00 : f32
    %35 = vector.broadcast %cst_16 : f32 to vector<16x32xf32>
    %36 = arith.addf %35, %34 : vector<16x32xf32>
    %37 = arith.mulf %31, %36 : vector<16x32xf32>
    %c0_17 = arith.constant 0 : index
    %c0_18 = arith.constant 0 : index
    %38 = vector.load %arg6[%c0_17, %c0_18] : memref<32x1664xf32, #tpu.memory_space<vmem>>, vector<32x1664xf32>
    %cst_19 = arith.constant dense<0.000000e+00> : vector<16x1664xf32>
    %39 = tpu.matmul %37, %38, %cst_19 {dimension_numbers = #tpu.dot_dimension_numbers<[1], [0], [0], [1], [0, 0, 1, 1], [], []>} : vector<16x32xf32>, vector<32x1664xf32>, vector<16x1664xf32> -> vector<16x1664xf32>
    %c0_20 = arith.constant 0 : index
    %c0_21 = arith.constant 0 : index
    %40 = vector.load %arg7[%c0_20, %c0_21] : memref<1x1664xf32, #tpu.memory_space<vmem>>, vector<1x1664xf32>
    %41 = vector.broadcast %40 : vector<1x1664xf32> to vector<16x1664xf32>
    %42 = arith.addf %39, %41 : vector<16x1664xf32>
    %c0_22 = arith.constant 0 : index
    %c0_23 = arith.constant 0 : index
    %43 = vector.load %arg10[%c0_22, %c0_23] : memref<16x1664xf32, #tpu.memory_space<vmem>>, vector<16x1664xf32>
    tpu.vector_store %arg10[%c0_22, %c0_23], %42 {strides = array<i32>} : memref<16x1664xf32, #tpu.memory_space<vmem>>, vector<16x1664xf32>,
    %c0_24 = arith.constant 0 : index
    %c0_25 = arith.constant 0 : index
    %44 = vector.load %arg8[%c0_24, %c0_25] : memref<32x512xf32, #tpu.memory_space<vmem>>, vector<32x512xf32>
    %cst_26 = arith.constant dense<0.000000e+00> : vector<16x512xf32>
    %45 = tpu.matmul %37, %44, %cst_26 {dimension_numbers = #tpu.dot_dimension_numbers<[1], [0], [0], [1], [0, 0, 1, 1], [], []>} : vector<16x32xf32>, vector<32x512xf32>, vector<16x512xf32> -> vector<16x512xf32>
    %c0_27 = arith.constant 0 : index
    %c0_28 = arith.constant 0 : index
    %46 = vector.load %arg9[%c0_27, %c0_28] : memref<1x512xf32, #tpu.memory_space<vmem>>, vector<1x512xf32>
    %47 = vector.broadcast %46 : vector<1x512xf32> to vector<16x512xf32>
    %48 = arith.addf %45, %47 : vector<16x512xf32>
    %49 = vector.extract_strided_slice %48 {offsets = [0, 0], sizes = [16, 256], strides = [1, 1]} : vector<16x512xf32> to vector<16x256xf32>
    %50 = vector.extract_strided_slice %48 {offsets = [0, 256], sizes = [16, 256], strides = [1, 1]} : vector<16x512xf32> to vector<16x256xf32>
    %51 = arith.mulf %49, %50 : vector<16x256xf32>
    %c0_29 = arith.constant 0 : index
    %c0_30 = arith.constant 0 : index
    %52 = vector.load %arg10[%c0_29, %c0_30] : memref<16x1664xf32, #tpu.memory_space<vmem>>, vector<16x64xf32>
    %53 = vector.extract_strided_slice %51 {offsets = [0, 0], sizes = [16, 64], strides = [1, 1]} : vector<16x256xf32> to vector<16x64xf32>
    %54 = arith.addf %52, %53 : vector<16x64xf32>
    %55 = vector.extract_strided_slice %51 {offsets = [0, 64], sizes = [16, 64], strides = [1, 1]} : vector<16x256xf32> to vector<16x64xf32>
    %56 = arith.addf %54, %55 : vector<16x64xf32>
    %57 = vector.extract_strided_slice %51 {offsets = [0, 128], sizes = [16, 64], strides = [1, 1]} : vector<16x256xf32> to vector<16x64xf32>
    %58 = arith.addf %56, %57 : vector<16x64xf32>
    %59 = vector.extract_strided_slice %51 {offsets = [0, 192], sizes = [16, 64], strides = [1, 1]} : vector<16x256xf32> to vector<16x64xf32>
    %60 = arith.addf %58, %59 : vector<16x64xf32>
    %c0_31 = arith.constant 0 : index
    %c0_32 = arith.constant 0 : index
    %61 = vector.load %arg10[%c0_31, %c0_32] : memref<16x1664xf32, #tpu.memory_space<vmem>>, vector<16x64xf32>
    tpu.vector_store %arg10[%c0_31, %c0_32], %60 {strides = array<i32>} : memref<16x1664xf32, #tpu.memory_space<vmem>>, vector<16x64xf32>,
    return
  }
  func.func @transform_0(%arg0: i32) -> (i32, i32) {
    %c0_i32 = arith.constant 0 : i32
    %c0_i32_0 = arith.constant 0 : i32
    return %arg0, %c0_i32 : i32, i32
  }
  func.func @transform_1(%arg0: i32) -> (i32, i32) {
    %c0_i32 = arith.constant 0 : i32
    %c0_i32_0 = arith.constant 0 : i32
    %c0_i32_1 = arith.constant 0 : i32
    return %c0_i32, %c0_i32_0 : i32, i32
  }
  func.func @transform_2(%arg0: i32) -> (i32, i32) {
    %c0_i32 = arith.constant 0 : i32
    %c0_i32_0 = arith.constant 0 : i32
    %c0_i32_1 = arith.constant 0 : i32
    return %c0_i32, %c0_i32_0 : i32, i32
  }
  func.func @transform_3(%arg0: i32) -> (i32, i32) {
    %c0_i32 = arith.constant 0 : i32
    %c0_i32_0 = arith.constant 0 : i32
    %c0_i32_1 = arith.constant 0 : i32
    return %c0_i32, %c0_i32_0 : i32, i32
  }
  func.func @transform_4(%arg0: i32) -> (i32, i32) {
    %c0_i32 = arith.constant 0 : i32
    %c0_i32_0 = arith.constant 0 : i32
    %c0_i32_1 = arith.constant 0 : i32
    return %c0_i32, %c0_i32_0 : i32, i32
  }
  func.func @transform_5(%arg0: i32) -> (i32, i32) {
    %c0_i32 = arith.constant 0 : i32
    %c0_i32_0 = arith.constant 0 : i32
    %c0_i32_1 = arith.constant 0 : i32
    return %c0_i32, %c0_i32_0 : i32, i32
  }
  func.func @transform_6(%arg0: i32) -> (i32, i32) {
    %c0_i32 = arith.constant 0 : i32
    %c0_i32_0 = arith.constant 0 : i32
    %c0_i32_1 = arith.constant 0 : i32
    return %c0_i32, %c0_i32_0 : i32, i32
  }
  func.func @transform_7(%arg0: i32) -> (i32, i32) {
    %c0_i32 = arith.constant 0 : i32
    %c0_i32_0 = arith.constant 0 : i32
    %c0_i32_1 = arith.constant 0 : i32
    return %c0_i32, %c0_i32_0 : i32, i32
  }
  func.func @transform_8(%arg0: i32) -> (i32, i32) {
    %c0_i32 = arith.constant 0 : i32
    %c0_i32_0 = arith.constant 0 : i32
    %c0_i32_1 = arith.constant 0 : i32
    return %c0_i32, %c0_i32_0 : i32, i32
  }
  func.func @transform_9(%arg0: i32) -> (i32, i32) {
    %c0_i32 = arith.constant 0 : i32
    %c0_i32_0 = arith.constant 0 : i32
    return %arg0, %c0_i32 : i32, i32
  }
}

</mosaic_0001>

<bundles_post_ra>
// kernel: tpu_custom_call.1
= control target key start
LH: loop header
LB: loop body
LE: loop exit
PB: predicated region body
PF: predicated region fallthrough
CT: control target
= control target key end

     0   :  { %14 = vsyncpa [#allocation3], 0  ;;  %s1695_s0 = inlined_call_operand.hbm [shape: f32[16,16], index: 0, kind: input, shape index: {}]   ;;  %s1696_s1 = inlined_call_operand.vmem [shape: f32[1,16], index: 1, kind: input, shape index: {}]   ;;  %s1697_s2 = inlined_call_operand.vmem [shape: f32[1,16], index: 2, kind: input, shape index: {}]   ;;  %s1698_s3 = inlined_call_operand.hbm [shape: f32[16,32], index: 3, kind: input, shape index: {}]   ;;  %s1699_s4 = inlined_call_operand.vmem [shape: f32[1,32], index: 4, kind: input, shape index: {}]   ;;  %s1700_s5 = inlined_call_operand.hbm [shape: f32[32,1664], index: 5, kind: input, shape index: {}]   ;;  %s1701_s6 = inlined_call_operand.vmem [shape: f32[1,1664], index: 6, kind: input, shape index: {}]   ;;  %s1702_s7 = inlined_call_operand.hbm [shape: f32[32,512], index: 7, kind: input, shape index: {}]   ;;  %s1703_s8 = inlined_call_operand.vmem [shape: f32[1,512], index: 8, kind: input, shape index: {}]   ;;  %s1704_s9 = inlined_call_operand.hbm [shape: f32[16,1664], index: 9, kind: output, shape index: {}]  }
   0x1   :  { %15 = vsyncpa [#allocation6], 0 }
   0x2   :  { %16 = vsyncpa [#allocation9], 0 }
   0x3   :  { %17 = vsyncpa [#allocation4], 0  ;;  %s1437_s30 = smov [#allocation5]   ;;  %s1438_s11 = smov [#allocation2]  }
   0x4   :  { %s39_s10 = sshll.u32 %s1437_s30, 4  ;;  %s23_s12 = sshll.u32 %s1438_s11, 4  ;;  %s40_s10 = int_to_ptr.vmem [resolvable:$true] %s39_s10  ;;  %s1500_s12 = int_to_ptr.vmem [resolvable:$true] %s23_s12 }
   0x5   :  { %s1319_s15 = scalar_lea.hbm %s1698_s3, 256 }
   0x6   :  { %p1320_p0 = scmp.ne.s32.totalorder %s1698_s3, %s1319_s15  ;;  %p1323_p1 = scmp.lt.u32.totalorder %s1319_s15, %s1698_s3 }
   0x8   :  { %p1325_p2 = pnand %p1323_p1, %p1320_p0 }
   0xa   :  { %1328 = shalt.err (!%p1325_p2)
}
   0xb   :  { %s1329_s20 = scalar_lea.vmem %s40_s10, 256  ;;  %p1334_p4 = scmp.lt.s32.totalorder %s40_s10, %s40_s10 }
   0xc   :  { %p1330_p3 = scmp.ne.s32.totalorder %s40_s10, %s1329_s20  ;;  %p1335_p5 = scmp.lt.s32.totalorder %s1329_s20, %s1329_s20 }
   0xe   :  { %p1336_p6 = por %p1335_p5, %p1334_p4 }
  0x10   :  { %p1337_p7 = pnand %p1336_p6, %p1330_p3 }
  0x12   :  { %1340 = shalt.err (!%p1337_p7)
}
  0x13   :  { %s1439_s21 = smov 128   ;;  %s1440_s22 = smov 8  }
  0x14   :  { %45 = dma.hbm_to_vmem [thread:$0]  %s1698_s3, 256, %s40_s10, [#allocation6], %s1439_s21, %s1439_s21, %s1440_s22  }
  0x15   :  { %s1341_s27 = scalar_lea.hbm %s1695_s0, 256 }
  0x16   :  { %p1342_p8 = scmp.ne.s32.totalorder %s1695_s0, %s1341_s27  ;;  %p1345_p9 = scmp.lt.u32.totalorder %s1341_s27, %s1695_s0 }
  0x18   :  { %p1347_p10 = pnand %p1345_p9, %p1342_p8 }
  0x1a   :  { %1350 = shalt.err (!%p1347_p10)
}
  0x1b   :  { %s1351_s13 = scalar_lea.vmem %s1500_s12, 256  ;;  %p1356_p12 = scmp.lt.s32.totalorder %s1500_s12, %s1500_s12 }
  0x1c   :  { %p1352_p11 = scmp.ne.s32.totalorder %s1500_s12, %s1351_s13  ;;  %p1357_p13 = scmp.lt.s32.totalorder %s1351_s13, %s1351_s13 }
  0x1e   :  { %p1358_p0 = por %p1357_p13, %p1356_p12 }
  0x20   :  { %p1359_p1 = pnand %p1358_p0, %p1352_p11 }
  0x22   :  { %1362 = shalt.err (!%p1359_p1)
}
  0x23   :  { %29 = dma.hbm_to_vmem [thread:$0]  %s1695_s0, 256, %s1500_s12, [#allocation3], %s1439_s21, %s1439_s21, %s1440_s22  }
  0x24   :  { %s1441_s14 = smov [#allocation7]   ;;  %s1363_s18 = scalar_lea.hbm %s1700_s5, 6656 }
  0x25   :  { %s53_s15 = sshll.u32 %s1441_s14, 4  ;;  %p1364_p2 = scmp.ne.s32.totalorder %s1700_s5, %s1363_s18  ;;  %s54_s15 = int_to_ptr.vmem [resolvable:$true] %s53_s15 }
  0x26   :  { %p1367_p3 = scmp.lt.u32.totalorder %s1363_s18, %s1700_s5 }
  0x28   :  { %p1369_p4 = pnand %p1367_p3, %p1364_p2 }
  0x2a   :  { %1372 = shalt.err (!%p1369_p4)
}
  0x2b   :  { %s1373_s25 = scalar_lea.vmem %s54_s15, 6656  ;;  %p1378_p6 = scmp.lt.s32.totalorder %s54_s15, %s54_s15 }
  0x2c   :  { %p1374_p5 = scmp.ne.s32.totalorder %s54_s15, %s1373_s25  ;;  %p1379_p7 = scmp.lt.s32.totalorder %s1373_s25, %s1373_s25 }
  0x2e   :  { %p1380_p8 = por %p1379_p7, %p1378_p6 }
  0x30   :  { %p1381_p9 = pnand %p1380_p8, %p1374_p5 }
  0x32   :  { %1384 = shalt.err (!%p1381_p9)
}
  0x33   :  { %s1442_s0 = smov 1664   ;;  %s1443_s12 = smov 104  }
  0x34   :  { %59 = dma.hbm_to_vmem [thread:$0]  %s1700_s5, 6656, %s54_s15, [#allocation6], %s1442_s0, %s1442_s0, %s1443_s12  }
  0x35   :  { %s1444_s26 = smov [#allocation8]   ;;  %s1385_s30 = scalar_lea.hbm %s1702_s7, 2048 }
  0x36   :  { %s67_s27 = sshll.u32 %s1444_s26, 4  ;;  %p1386_p10 = scmp.ne.s32.totalorder %s1702_s7, %s1385_s30  ;;  %s68_s27 = int_to_ptr.vmem [resolvable:$true] %s67_s27 }
  0x37   :  { %p1389_p11 = scmp.lt.u32.totalorder %s1385_s30, %s1702_s7 }
  0x39   :  { %p1391_p12 = pnand %p1389_p11, %p1386_p10 }
  0x3b   :  { %1394 = shalt.err (!%p1391_p12)
}
  0x3c   :  { %s1395_s14 = scalar_lea.vmem %s68_s27, 2048  ;;  %p1400_p0 = scmp.lt.s32.totalorder %s68_s27, %s68_s27 }
  0x3d   :  { %p1396_p13 = scmp.ne.s32.totalorder %s68_s27, %s1395_s14  ;;  %p1401_p1 = scmp.lt.s32.totalorder %s1395_s14, %s1395_s14 }
  0x3f   :  { %p1402_p2 = por %p1401_p1, %p1400_p0 }
  0x41   :  { %p1403_p3 = pnand %p1402_p2, %p1396_p13 }
  0x43   :  { %1406 = shalt.err (!%p1403_p3)
}
  0x44   :  { %s1445_s5 = smov 512   ;;  %s1446_s15 = smov 32  }
  0x45   :  { %73 = dma.hbm_to_vmem [thread:$0]  %s1702_s7, 2048, %s68_s27, [#allocation9], %s1445_s5, %s1445_s5, %s1446_s15  }
  0x46   :  { %1429 = dma.done.wait [#allocation3], 256  }
  0x47   :  { %1430 = vsyncadd [#allocation3], 4294967040 }
  0x48   :  { %1431 = dma.done.wait [#allocation6], 6912  }
  0x49   :  { %1432 = vsyncadd [#allocation6], 4294960384 }
  0x4a   :  { %1433 = dma.done.wait [#allocation9], 2048  }
  0x4b   :  { %1434 = vsyncadd [#allocation9], 4294965248  ;;  %vm90_vm0 = vcmask 130048   ;;  %v88_v0 = vld [vmem:[#allocation2] sm:$0xff]  ;;  %v89_v1 = vld [vmem:[#allocation2 + $0x8] sm:$0xff]  ;;  %v1447_v62 = vmov 0.0  }
  0x4c   :  { %v91_v2 = vsel %vm90_vm0, %v88_v0, 0.0  ;;  %v94_v3 = vsel %vm90_vm0, %v89_v1, 0.0  ;;  %v136_v14 = vld [vmem:[#allocation5] sm:$0xff]  ;;  %v137_v15 = vld [vmem:[#allocation5 + $0x8] sm:$0xff]  ;;  %v1171_v24 = vld [vmem:[%s1696_s1] ss:$0 sm:$0xff]  ;;  %428 = vmatprep.mubr.f32.mxu1 %v1447_v62 }
  0x4d   :  { %92 = vadd.xlane.f32.xlu0 %v91_v2  ;;  %v1222_v16 = vpack.c.bf16 %v137_v15, %v136_v14  ;;  %v1172_v26 = vld [vmem:[%s1697_s2] ss:$0 sm:$0xff]  ;;  %v237_v33 = vld [vmem:[#allocation7 + $0x8] sm:$0xff]  ;;  %v250_v34 = vld [vmem:[#allocation7 + $0x70] sm:$0xff]  ;;  %vm357_vm1 = vcmask 261120   ;;  %vm1149_vm2 = vcmask 523264  }
  0x4e   :  { %v1226_v35 = vpack.c.bf16 %v250_v34, %v237_v33  ;;  %v236_v36 = vld [vmem:[#allocation7] sm:$0xff]  ;;  %v249_v37 = vld [vmem:[#allocation7 + $0x68] sm:$0xff]  ;;  %v239_v38 = vld [vmem:[#allocation7 + $0x18] sm:$0xff]  ;;  %s1449_s22 = smov [#allocation10]  }
  0x4f   :  { %1223 = vmatprep.subr.bf16.mxu0 %v1222_v16  ;;  %v1228_v39 = vpack.c.bf16 %v249_v37, %v236_v36  ;;  %v252_v40 = vld [vmem:[#allocation7 + $0x80] sm:$0xff]  ;;  %v238_v41 = vld [vmem:[#allocation7 + $0x10] sm:$0xff]  ;;  %v251_v42 = vld [vmem:[#allocation7 + $0x78] sm:$0xff]  ;;  %s1157_s26 = sshll.u32 %s1449_s22, 4  ;;  %s1158_s26 = int_to_ptr.vmem [resolvable:$true] %s1157_s26 }
  0x50   :  { %1225 = vmatpush3.bf16.msra.mxu0 %v1222_v16  ;;  %1227 = vmatprep.subr.bf16.mxu1 %v1226_v35  ;;  %v1234_v43 = vpack.c.bf16 %v252_v40, %v239_v38  ;;  %v1236_v44 = vpack.c.bf16 %v251_v42, %v238_v41  ;;  %v263_v45 = vld [vmem:[#allocation7 + $0xd8] sm:$0xff]  ;;  %v276_v46 = vld [vmem:[#allocation7 + $0x140] sm:$0xff]  ;;  %v262_v48 = vld [vmem:[#allocation7 + $0xd0] sm:$0xff]  ;;  %s1407_s27 = scalar_lea.vmem %s1158_s26, 3328  ;;  %p1412_p5 = scmp.lt.s32.totalorder %s1158_s26, %s1158_s26 }
  0x51   :  { %95 = vadd.xlane.f32.xlu0 %v94_v3  ;;  %1229 = vmatpush1.bf16.msra.mxu1 %v1228_v39  ;;  %v1230_v47 = vpack.c.bf16 %v276_v46, %v263_v45  ;;  %v275_v49 = vld [vmem:[#allocation7 + $0x138] sm:$0xff]  ;;  %v265_v50 = vld [vmem:[#allocation7 + $0xe8] sm:$0xff]  ;;  %v278_v52 = vld [vmem:[#allocation7 + $0x150] sm:$0xff]  ;;  %p1408_p4 = scmp.ne.s32.totalorder %s1158_s26, %s1407_s27  ;;  %p1413_p6 = scmp.lt.s32.totalorder %s1407_s27, %s1407_s27 }
  0x52   :  { %1235 = vmatprep.subr.bf16.mxu0 %v1234_v43  ;;  %v1232_v51 = vpack.c.bf16 %v275_v49, %v262_v48  ;;  %v264_v53 = vld [vmem:[#allocation7 + $0xe0] sm:$0xff]  ;;  %v277_v54 = vld [vmem:[#allocation7 + $0x148] sm:$0xff]  ;;  %v1238_v55 = vpack.c.bf16 %v278_v52, %v265_v50  ;;  %v254_v58 = vld [vmem:[#allocation7 + $0x90] sm:$0xff] }
  0x53   :  { %1231 = vmatprep.subr.bf16.mxu1 %v1230_v47  ;;  %v1240_v56 = vpack.c.bf16 %v277_v54, %v264_v53  ;;  %v241_v57 = vld [vmem:[#allocation7 + $0x28] sm:$0xff]  ;;  %v243_v60 = vld [vmem:[#allocation7 + $0x38] sm:$0xff]  ;;  %v256_v61 = vld [vmem:[#allocation7 + $0xa0] sm:$0xff]  ;;  %p1414_p7 = por %p1413_p6, %p1412_p5 }
  0x54   :  { %v1242_v59 = vpack.c.bf16 %v254_v58, %v241_v57  ;;  %v1250_v63 = vpack.c.bf16 %v256_v61, %v243_v60  ;;  %v280_v16 = vld [vmem:[#allocation7 + $0x160] sm:$0xff]  ;;  %v257_v38 = vld [vmem:[#allocation7 + $0xa8] sm:$0xff]  ;;  %v246_v39 = vld [vmem:[#allocation7 + $0x50] sm:$0xff] }
  0x55   :  { %1233 = vmatpush1.bf16.msra.mxu1 %v1232_v51  ;;  %v260_v33 = vld [vmem:[#allocation7 + $0xc0] sm:$0xff]  ;;  %v259_v40 = vld [vmem:[#allocation7 + $0xb8] sm:$0xff]  ;;  %v273_v45 = vld [vmem:[#allocation7 + $0x128] sm:$0xff]  ;;  %p1415_p8 = pnand %p1414_p7, %p1408_p4 }
  0x56   :  { %1243 = vmatprep.subr.bf16.mxu1 %v1242_v59  ;;  %v244_v36 = vld [vmem:[#allocation7 + $0x40] sm:$0xff]  ;;  %v271_v43 = vld [vmem:[#allocation7 + $0x118] sm:$0xff]  ;;  %v286_v46 = vld [vmem:[#allocation7 + $0x190] sm:$0xff]  ;;  %v1268_v48 = vpack.c.bf16 %v259_v40, %v246_v39 }
  0x57   :  { %v1260_v47 = vpack.c.bf16 %v257_v38, %v244_v36  ;;  %v270_v49 = vld [vmem:[#allocation7 + $0x110] sm:$0xff]  ;;  %v283_v50 = vld [vmem:[#allocation7 + $0x178] sm:$0xff]  ;;  %v272_v51 = vld [vmem:[#allocation7 + $0x120] sm:$0xff]  ;;  %v1270_v54 = vpack.c.bf16 %v286_v46, %v273_v45 }
  0x58   :  { %v285_v52 = vld [vmem:[#allocation7 + $0x188] sm:$0xff]  ;;  %v1264_v59 = vpack.c.bf16 %v283_v50, %v270_v49  ;;  %v927_v61 = vld [vmem:[#allocation8] sm:$0xff] }
  0x59   :  { %v928_v57 = vld [vmem:[#allocation8 + $0x8] sm:$0xff]  ;;  %v1272_v60 = vpack.c.bf16 %v285_v52, %v272_v51 }
  0x5a   :  { %v932_v58 = vld [vmem:[#allocation8 + $0x28] sm:$0xff] }
  0xda   :  { %v93_v4 = vpop.xlane.xlu0 %92 }
  0xdb   :  { %v98_v5 = vmul.f32 0.0625, %v93_v4 }
  0xdd   :  { %v100_v6 = vsub.f32 %v88_v0, %v98_v5  ;;  %v1173_v0 = vld [vmem:[%s1699_s4] ss:$0 sm:$0xff] }
  0xde   :  { %v96_v7 = vpop.xlane.xlu0 %95 }
  0xdf   :  { %v99_v8 = vmul.f32 0.0625, %v96_v7  ;;  %v102_v9 = vmul.f32 %v100_v6, %v100_v6  ;;  %v240_v7 = vld [vmem:[#allocation7 + $0x20] sm:$0xff] }
  0xe1   :  { %v101_v10 = vsub.f32 %v89_v1, %v99_v8  ;;  %v104_v11 = vsel %vm90_vm0, %v102_v9, 0.0  ;;  %v253_v9 = vld [vmem:[#allocation7 + $0x88] sm:$0xff] }
  0xe2   :  { %105 = vadd.xlane.f32.xlu1 %v104_v11  ;;  %v255_v11 = vld [vmem:[#allocation7 + $0x98] sm:$0xff] }
  0xe3   :  { %v103_v12 = vmul.f32 %v101_v10, %v101_v10 }
  0xe5   :  { %v107_v13 = vsel %vm90_vm0, %v103_v12, 0.0 }
  0xe6   :  { %108 = vadd.xlane.f32.xlu1 %v107_v13  ;;  %v267_v13 = vld [vmem:[#allocation7 + $0xf8] sm:$0xff] }
 0x16f   :  { %v106_v17 = vpop.xlane.xlu1 %105 }
 0x170   :  { %v110_v18 = vmul.f32 0.0625, %v106_v17  ;;  %v269_v17 = vld [vmem:[#allocation7 + $0x108] sm:$0xff] }
 0x172   :  { %v112_v19 = vadd.f32 1e-05, %v110_v18  ;;  %v282_v18 = vld [vmem:[#allocation7 + $0x170] sm:$0xff] }
 0x173   :  { %v109_v20 = vpop.xlane.xlu1 %108 }
 0x174   :  { %1311 = vrsqrt.f32 %v112_v19  ;;  %v111_v21 = vmul.f32 0.0625, %v109_v20  ;;  %v1244_v19 = vpack.c.bf16 %v253_v9, %v240_v7  ;;  %v935_v9 = vld [vmem:[#allocation8 + $0x40] sm:$0xff] }
 0x176   :  { %v113_v22 = vadd.f32 1e-05, %v111_v21  ;;  %v266_v21 = vld [vmem:[#allocation7 + $0xf0] sm:$0xff] }
 0x178   :  { %1313 = vrsqrt.f32 %v113_v22 }
 0x17e   :  { %v1312_v23 = vpop.eup %1311 }
 0x17f   :  { %v116_v25 = vmul.f32 %v1312_v23, %v100_v6 }
 0x181   :  { %v125_v27 = vmul.f32 %v1171_v24, %v116_v25  ;;  %v268_v25 = vld [vmem:[#allocation7 + $0x100] sm:$0xff] }
 0x182   :  { %v1314_v28 = vpop.eup %1313 }
 0x183   :  { %v117_v29 = vmul.f32 %v1314_v28, %v101_v10  ;;  %v134_v30 = vadd.f32 %v1172_v26, %v125_v27  ;;  %v242_v10 = vld [vmem:[#allocation7 + $0x30] sm:$0xff]  ;;  %v1246_v27 = vpack.c.bf16 %v280_v16, %v267_v13  ;;  %v1254_v28 = vpack.c.bf16 %v282_v18, %v269_v17  ;;  %v938_v17 = vld [vmem:[#allocation8 + $0x58] sm:$0xff] }
 0x184   :  { %v1252_v20 = vpack.c.bf16 %v255_v11, %v242_v10  ;;  %v939_v10 = vld [vmem:[#allocation8 + $0x60] sm:$0xff]  ;;  %v930_v11 = vld [vmem:[#allocation8 + $0x18] sm:$0xff] }
 0x185   :  { %v126_v31 = vmul.f32 %v1171_v24, %v117_v29  ;;  %1208 = vmatprep.mubr.msk.f32.mxu0 %vm90_vm0, %v134_v30  ;;  %v279_v24 = vld [vmem:[#allocation7 + $0x158] sm:$0xff]  ;;  %v245_v29 = vld [vmem:[#allocation7 + $0x48] sm:$0xff]  ;;  %v1288_v13 = vpack.c.bf16 %v939_v10, %v935_v9 }
 0x186   :  { %v1248_v34 = vpack.c.bf16 %v279_v24, %v266_v21  ;;  %v942_v18 = vld [vmem:[#allocation8 + $0x78] sm:$0xff]  ;;  %v937_v21 = vld [vmem:[#allocation8 + $0x50] sm:$0xff] }
 0x187   :  { %v135_v32 = vadd.f32 %v1172_v26, %v126_v31  ;;  %v281_v26 = vld [vmem:[#allocation7 + $0x168] sm:$0xff]  ;;  %v258_v31 = vld [vmem:[#allocation7 + $0xb0] sm:$0xff] }
 0x188   :  { %v1256_v35 = vpack.c.bf16 %v281_v26, %v268_v25  ;;  %v1258_v41 = vpack.c.bf16 %v258_v31, %v245_v29  ;;  %v292_v25 = vlaneseq  ;;  %v288_v29 = vld [vmem:[%s1701_s6] sm:$0xff] }
 0x189   :  { %1209 = vmatmul.mubr.msk.f32.vlgmr.msra.gmra.mrb[0].mxu0 %vm90_vm0, %v135_v32  ;;  %v247_v32 = vld [vmem:[#allocation7 + $0x58] sm:$0xff] }
 0x18a   :  { %1237 = vmatpush1.bf16.msra.mxu0 %v1236_v44  ;;  %505 = vmatprep.mubr.f32.mxu0 %v1447_v62  ;;  %v1266_v42 = vpack.c.bf16 %v260_v33, %v247_v32  ;;  %v284_v44 = vld [vmem:[#allocation7 + $0x180] sm:$0xff]  ;;  %v1629_v26 = vshrl.u32 %v292_v25, 7 }
 0x18b   :  { %1239 = vmatprep.subr.bf16.mxu0 %v1238_v55  ;;  %v1262_v53 = vpack.c.bf16 %v284_v44, %v271_v43  ;;  %v248_v55 = vld [vmem:[#allocation7 + $0x60] sm:$0xff] }
 0x18c   :  { %v310_v40 = vsub.s32 4, %v1629_v26  ;;  %v314_v44 = vsub.s32 5, %v1629_v26  ;;  %v322_v45 = vsub.s32 7, %v1629_v26 }
 0x18e   :  { %1241 = vmatpush1.bf16.msra.mxu0 %v1240_v56  ;;  %v261_v56 = vld [vmem:[#allocation7 + $0xc8] sm:$0xff]  ;;  %v311_v52 = vrot.slane %v288_v29, %v310_v40 }
 0x18f   :  { %1251 = vmatprep.subr.bf16.mxu0 %v1250_v63  ;;  %v931_v63 = vld [vmem:[#allocation8 + $0x20] sm:$0xff] }
 0x25c   :  { %v1210_v1 = vpop.f32.mrb[0].mxu0 }
 0x25d   :  { %v223_v2 = vadd.f32 %v1210_v1, %v1173_v0  ;;  %v217_v3 = vpop.f32.mrb[1].mxu0  ;;  %v1282_v1 = vpack.c.bf16 %v932_v58, %v928_v57  ;;  %v323_v57 = vrot.slane %v288_v29, %v322_v45 }
 0x25e   :  { %v218_v4 = vadd.f32 %v1173_v0, %v217_v3  ;;  %v1274_v0 = vpack.c.bf16 %v261_v56, %v248_v55  ;;  %v287_v3 = vld [vmem:[#allocation7 + $0x198] sm:$0xff]  ;;  %v315_v56 = vrot.slane %v288_v29, %v314_v44 }
 0x25f   :  { %v229_v5 = vmul.f32 0.70710677, %v223_v2  ;;  %v227_v30 = vmul.f32 0.5, %v223_v2  ;;  %v274_v2 = vld [vmem:[#allocation7 + $0x130] sm:$0xff] }
 0x260   :  { %v228_v6 = vmul.f32 0.70710677, %v218_v4  ;;  %v226_v14 = vmul.f32 0.5, %v218_v4  ;;  %v936_v4 = vld [vmem:[#allocation8 + $0x48] sm:$0xff]  ;;  %v1278_v7 = vpack.c.bf16 %v287_v3, %v274_v2 }
 0x261   :  { %1315 = verf.f32 %v229_v5  ;;  %v940_v5 = vld [vmem:[#allocation8 + $0x68] sm:$0xff] }
 0x262   :  { %1317 = verf.f32 %v228_v6  ;;  %v1284_v6 = vpack.c.bf16 %v931_v63, %v927_v61  ;;  %v289_v3 = vld [vmem:[%s1701_s6 + $0x8] sm:$0x1f] }
 0x26b   :  { %v1316_v8 = vpop.eup %1315 }
 0x26c   :  { %v1318_v12 = vpop.eup %1317  ;;  %v233_v22 = vadd.f32 1.0, %v1316_v8  ;;  %v1286_v8 = vpack.c.bf16 %v940_v5, %v936_v4 }
 0x26d   :  { %v232_v15 = vadd.f32 1.0, %v1318_v12  ;;  %v934_v12 = vld [vmem:[#allocation8 + $0x38] sm:$0xff] }
 0x26e   :  { %v1581_v37 = vmul.f32 %v233_v22, %v227_v30  ;;  %v1290_v16 = vpack.c.bf16 %v934_v12, %v930_v11  ;;  %v941_v22 = vld [vmem:[#allocation8 + $0x70] sm:$0xff] }
 0x26f   :  { %v1575_v23 = vmul.f32 %v232_v15, %v226_v14  ;;  %v929_v14 = vld [vmem:[#allocation8 + $0x10] sm:$0xff]  ;;  %v1296_v24 = vpack.c.bf16 %v941_v22, %v937_v21 }
 0x270   :  { %v933_v15 = vld [vmem:[#allocation8 + $0x30] sm:$0xff] }
 0x271   :  { %1176 = vmatmul.mubr.msk.f32.vlgmr.msra.gmra.mrb[0].mxu1 %vm357_vm1, %v1575_v23  ;;  %1178 = vmatmul.mubr.msk.f32.vlgmr.msra.gmra.mrb[2].mxu0 %vm357_vm1, %v1575_v23 }
 0x272   :  { %1245 = vmatpush1.bf16.msra.mxu1 %v1244_v19  ;;  %1253 = vmatpush1.bf16.msra.mxu0 %v1252_v20  ;;  %v1292_v19 = vpack.c.bf16 %v933_v15, %v929_v14  ;;  %v1294_v20 = vpack.c.bf16 %v942_v18, %v938_v17 }
 0x273   :  { %434 = vmatprep.mubr.f32.mxu1 %v1447_v62  ;;  %511 = vmatprep.mubr.f32.mxu0 %v1447_v62 }
 0x274   :  { %1247 = vmatprep.subr.bf16.mxu1 %v1246_v27  ;;  %1255 = vmatprep.subr.bf16.mxu0 %v1254_v28  ;;  %v1632_v27 = vsub.s32 0, %v1629_v26  ;;  %v1635_v28 = vsub.s32 2, %v1629_v26 }
 0x275   :  { %1177 = vmatmul.mubr.msk.f32.gmra.mrb[2].mxu1 %vm357_vm1, %v1581_v37  ;;  %1179 = vmatmul.mubr.msk.f32.gmra.mrb[4].mxu0 %vm357_vm1, %v1581_v37 }
 0x276   :  { %1249 = vmatpush1.bf16.msra.mxu1 %v1248_v34  ;;  %1257 = vmatpush1.bf16.msra.mxu0 %v1256_v35  ;;  %v295_v30 = vrot.slane %v288_v29, %v1632_v27  ;;  %v303_v31 = vrot.slane %v288_v29, %v1635_v28  ;;  %v327_v10 = vrot.slane %v289_v3, %v1632_v27 }
 0x277   :  { %582 = vmatprep.mubr.f32.mxu1 %v1447_v62  ;;  %659 = vmatprep.mubr.f32.mxu0 %v1447_v62  ;;  %v335_v11 = vrot.slane %v289_v3, %v1635_v28 }
 0x278   :  { %1259 = vmatprep.subr.bf16.mxu1 %v1258_v41  ;;  %1267 = vmatprep.subr.bf16.mxu0 %v1266_v42  ;;  %v318_v41 = vsub.s32 6, %v1629_v26 }
 0x279   :  { %1180 = vmatmul.mubr.msk.f32.vlgmr.msra.gmra.mrb[4].mxu1 %vm357_vm1, %v1575_v23  ;;  %1182 = vmatmul.mubr.msk.f32.vlgmr.msra.gmra.mrb[6].mxu0 %vm357_vm1, %v1575_v23 }
 0x27a   :  { %1261 = vmatpush1.bf16.msra.mxu1 %v1260_v47  ;;  %1269 = vmatpush1.bf16.msra.mxu0 %v1268_v48 }
 0x27b   :  { %588 = vmatprep.mubr.f32.mxu1 %v1447_v62  ;;  %665 = vmatprep.mubr.f32.mxu0 %v1447_v62 }
 0x27c   :  { %1263 = vmatprep.subr.bf16.mxu1 %v1262_v53  ;;  %1271 = vmatprep.subr.bf16.mxu0 %v1270_v54  ;;  %v319_v53 = vrot.slane %v288_v29, %v318_v41 }
 0x27d   :  { %1181 = vmatmul.mubr.msk.f32.gmra.mrb[6].mxu1 %vm357_vm1, %v1581_v37  ;;  %1183 = vmatmul.mubr.msk.f32.gmra.mrb[8].mxu0 %vm357_vm1, %v1581_v37 }
 0x27e   :  { %1265 = vmatpush1.bf16.msra.mxu1 %v1264_v59  ;;  %1273 = vmatpush1.bf16.msra.mxu0 %v1272_v60 }
 0x27f   :  { %736 = vmatprep.mubr.f32.mxu1 %v1447_v62  ;;  %813 = vmatprep.mubr.f32.mxu0 %v1447_v62 }
 0x280   :  { %1275 = vmatprep.subr.bf16.mxu1 %v1274_v0  ;;  %1283 = vmatprep.subr.bf16.mxu0 %v1282_v1 }
 0x281   :  { %1184 = vmatmul.mubr.msk.f32.vlgmr.msra.gmra.mrb[8].mxu1 %vm357_vm1, %v1575_v23  ;;  %1186 = vmatmul.mubr.msk.f32.vlgmr.msra.gmra.mrb[10].mxu0 %vm357_vm1, %v1575_v23 }
 0x282   :  { %1277 = vmatpush3.bf16.msra.mxu1 %v1274_v0  ;;  %1285 = vmatpush1.bf16.msra.mxu0 %v1284_v6 }
 0x283   :  { %742 = vmatprep.mubr.f32.mxu1 %v1447_v62  ;;  %819 = vmatprep.mubr.f32.mxu0 %v1447_v62 }
 0x284   :  { %1279 = vmatprep.subr.bf16.mxu1 %v1278_v7  ;;  %1287 = vmatprep.subr.bf16.mxu0 %v1286_v8 }
 0x285   :  { %1185 = vmatmul.mubr.msk.f32.gmra.mrb[10].mxu1 %vm357_vm1, %v1581_v37  ;;  %1187 = vmatmul.mubr.msk.f32.gmra.mrb[12].mxu0 %vm357_vm1, %v1581_v37 }
 0x286   :  { %1281 = vmatpush3.bf16.msra.mxu1 %v1278_v7  ;;  %1219 = vmatprep.mubr.msk.f32.mxu1 %vm357_vm1, %v1575_v23 }
 0x287   :  { %1289 = vmatpush1.bf16.msra.mxu0 %v1288_v13  ;;  %1029 = vmatprep.mubr.f32.mxu0 %v1447_v62 }
 0x288   :  { %1291 = vmatprep.subr.bf16.mxu1 %v1290_v16 }
 0x289   :  { %1220 = vmatmul.mubr.msk.f32.vlgmr.msra.gmra.mrb[12].mxu1 %vm357_vm1, %v1581_v37 }
 0x28a   :  { %1190 = vmatmul.mubr.msk.f32.vlgmr.msra.gmra.mrb[14].mxu0 %vm357_vm1, %v1575_v23  ;;  %1293 = vmatpush1.bf16.msra.mxu1 %v1292_v19 }
 0x28b   :  { %1035 = vmatprep.mubr.f32.mxu0 %v1447_v62  ;;  %1295 = vmatprep.subr.bf16.mxu1 %v1294_v20 }
 0x28c   :  { %1106 = vmatprep.mubr.f32.mxu1 %v1447_v62 }
 0x28e   :  { %1191 = vmatmul.mubr.msk.f32.gmra.mrb[16].mxu0 %vm357_vm1, %v1581_v37  ;;  %1297 = vmatpush1.bf16.msra.mxu1 %v1296_v24 }
 0x291   :  { %1192 = vmatmul.mubr.msk.f32.vlgmr.msra.gmra.mrb[14].mxu1 %vm357_vm1, %v1575_v23  ;;  %v1641_v23 = vsub.s32 1, %v1629_v26 }
 0x292   :  { %1112 = vmatprep.mubr.f32.mxu1 %v1447_v62  ;;  %v1644_v62 = vsub.s32 3, %v1629_v26 }
 0x293   :  { %v299_v32 = vrot.slane %v288_v29, %v1641_v23  ;;  %v331_v14 = vrot.slane %v289_v3, %v1641_v23 }
 0x294   :  { %v307_v33 = vrot.slane %v288_v29, %v1644_v62  ;;  %v339_v15 = vrot.slane %v289_v3, %v1644_v62 }
 0x295   :  { %1193 = vmatmul.mubr.msk.f32.gmra.mrb[16].mxu1 %vm357_vm1, %v1581_v37 }
 0x344   :  { %v430_v34 = vpop.f32.mrb[0].mxu1  ;;  %v507_v35 = vpop.f32.mrb[2].mxu0 }
 0x345   :  { %v1650_v36 = vadd.f32 %v430_v34, %v295_v30  ;;  %v508_v37 = vadd.f32 %v507_v35, %v303_v31  ;;  %v432_v38 = vpop.f32.mrb[1].mxu1  ;;  %v509_v39 = vpop.f32.mrb[3].mxu0  ;;  %v343_v34 = vrot.slane %v289_v3, %v310_v40 }
 0x346   :  { %v433_v42 = vadd.f32 %v432_v38, %v299_v32  ;;  %v510_v43 = vadd.f32 %v509_v39, %v307_v33 }
 0x347   :  { %901 = vst [vmem:[#allocation10] sm:$0xff] %v1650_v36  ;;  %903 = vst [vmem:[#allocation10 + $0x10] sm:$0xff] %v508_v37 }
 0x348   :  { %902 = vst [vmem:[#allocation10 + $0x8] sm:$0xff] %v433_v42  ;;  %904 = vst [vmem:[#allocation10 + $0x18] sm:$0xff] %v510_v43  ;;  %v436_v46 = vpop.f32.mrb[2].mxu1  ;;  %v513_v47 = vpop.f32.mrb[4].mxu0  ;;  %v943_v43 = vld [vmem:[%s1703_s8] sm:$0xf] }
 0x349   :  { %v1657_v48 = vadd.f32 %v436_v46, %v295_v30  ;;  %v514_v49 = vadd.f32 %v513_v47, %v303_v31  ;;  %v438_v50 = vpop.f32.mrb[3].mxu1  ;;  %v515_v51 = vpop.f32.mrb[5].mxu0  ;;  %v948_v26 = vrot.slane %v943_v43, %v1632_v27  ;;  %v956_v46 = vrot.slane %v943_v43, %v1635_v28  ;;  %s1448_s8 = smov 64  }
 0x34a   :  { %v439_v54 = vadd.f32 %v438_v50, %v299_v32  ;;  %v516_v55 = vadd.f32 %v515_v51, %v307_v33  ;;  %v952_v47 = vrot.slane %v943_v43, %v1641_v23  ;;  %v960_v50 = vrot.slane %v943_v43, %v1644_v62 }
 0x34b   :  { %914 = vst [vmem:[#allocation10 + $0x68] sm:$0xff] %v1657_v48  ;;  %916 = vst [vmem:[#allocation10 + $0x78] sm:$0xff] %v514_v49 }
 0x34c   :  { %915 = vst [vmem:[#allocation10 + $0x70] sm:$0xff] %v439_v54  ;;  %917 = vst [vmem:[#allocation10 + $0x80] sm:$0xff] %v516_v55  ;;  %v584_v58 = vpop.f32.mrb[4].mxu1  ;;  %v661_v59 = vpop.f32.mrb[6].mxu0 }
 0x34d   :  { %v585_v60 = vadd.f32 %v584_v58, %v311_v52  ;;  %v662_v61 = vadd.f32 %v661_v59, %v319_v53  ;;  %v586_v63 = vpop.f32.mrb[5].mxu1  ;;  %v663_v0 = vpop.f32.mrb[7].mxu0 }
 0x34e   :  { %v587_v1 = vadd.f32 %v586_v63, %v315_v56  ;;  %v664_v2 = vadd.f32 %v663_v0, %v323_v57 }
 0x34f   :  { %905 = vst [vmem:[#allocation10 + $0x20] sm:$0xff] %v585_v60  ;;  %907 = vst [vmem:[#allocation10 + $0x30] sm:$0xff] %v662_v61 }
 0x350   :  { %906 = vst [vmem:[#allocation10 + $0x28] sm:$0xff] %v587_v1  ;;  %908 = vst [vmem:[#allocation10 + $0x38] sm:$0xff] %v664_v2  ;;  %v590_v4 = vpop.f32.mrb[6].mxu1  ;;  %v667_v5 = vpop.f32.mrb[8].mxu0 }
 0x351   :  { %v591_v6 = vadd.f32 %v590_v4, %v311_v52  ;;  %v668_v7 = vadd.f32 %v667_v5, %v319_v53  ;;  %v592_v8 = vpop.f32.mrb[7].mxu1  ;;  %v669_v9 = vpop.f32.mrb[9].mxu0 }
 0x352   :  { %v593_v12 = vadd.f32 %v592_v8, %v315_v56  ;;  %v670_v13 = vadd.f32 %v669_v9, %v323_v57 }
 0x353   :  { %918 = vst [vmem:[#allocation10 + $0x88] sm:$0xff] %v591_v6  ;;  %920 = vst [vmem:[#allocation10 + $0x98] sm:$0xff] %v668_v7 }
 0x354   :  { %919 = vst [vmem:[#allocation10 + $0x90] sm:$0xff] %v593_v12  ;;  %921 = vst [vmem:[#allocation10 + $0xa0] sm:$0xff] %v670_v13  ;;  %v738_v16 = vpop.f32.mrb[8].mxu1  ;;  %v815_v17 = vpop.f32.mrb[10].mxu0 }
 0x355   :  { %v739_v18 = vadd.f32 %v738_v16, %v327_v10  ;;  %v816_v19 = vadd.f32 %v815_v17, %v335_v11  ;;  %v740_v20 = vpop.f32.mrb[9].mxu1  ;;  %v817_v21 = vpop.f32.mrb[11].mxu0 }
 0x356   :  { %v741_v22 = vadd.f32 %v740_v20, %v331_v14  ;;  %v818_v24 = vadd.f32 %v817_v21, %v339_v15 }
 0x357   :  { %909 = vst [vmem:[#allocation10 + $0x40] sm:$0xff] %v739_v18  ;;  %911 = vst [vmem:[#allocation10 + $0x50] sm:$0xff] %v816_v19 }
 0x358   :  { %910 = vst [vmem:[#allocation10 + $0x48] sm:$0xff] %v741_v22  ;;  %912 = vst [vmem:[#allocation10 + $0x58] sm:$0xff] %v818_v24  ;;  %v744_v25 = vpop.f32.mrb[10].mxu1  ;;  %v821_v29 = vpop.f32.mrb[12].mxu0 }
 0x359   :  { %v745_v30 = vadd.f32 %v744_v25, %v327_v10  ;;  %v822_v31 = vadd.f32 %v821_v29, %v335_v11  ;;  %v746_v32 = vpop.f32.mrb[11].mxu1  ;;  %v823_v33 = vpop.f32.mrb[13].mxu0 }
 0x35a   :  { %v747_v35 = vadd.f32 %v746_v32, %v331_v14  ;;  %v824_v37 = vadd.f32 %v823_v33, %v339_v15 }
 0x35b   :  { %922 = vst [vmem:[#allocation10 + $0xa8] sm:$0xff] %v745_v30  ;;  %924 = vst [vmem:[#allocation10 + $0xb8] sm:$0xff] %v822_v31 }
 0x35c   :  { %923 = vst [vmem:[#allocation10 + $0xb0] sm:$0xff] %v747_v35  ;;  %925 = vst [vmem:[#allocation10 + $0xc0] sm:$0xff] %v824_v37  ;;  %v1221_v38 = vpop.f32.mrb[12].mxu1 }
 0x35d   :  { %v898_v39 = vadd.f32 %v1221_v38, %v343_v34  ;;  %v1031_v41 = vpop.f32.mrb[14].mxu0  ;;  %v892_v42 = vpop.f32.mrb[13].mxu1 }
 0x35e   :  { %v893_v44 = vadd.f32 %v892_v42, %v343_v34  ;;  %v1033_v45 = vpop.f32.mrb[15].mxu0  ;;  %v1032_v52 = vadd.f32 %v1031_v41, %v948_v26 }
 0x35f   :  { %926 = vst [vmem:[#allocation10 + $0xc8] sm:$0xff] %v898_v39  ;;  %v1034_v55 = vadd.f32 %v1033_v45, %v952_v47 }
 0x360   :  { %913 = vst [vmem:[#allocation10 + $0x60] sm:$0xff] %v893_v44 }
 0x361   :  { %v1037_v40 = vpop.f32.mrb[16].mxu0 }
 0x362   :  { %v1039_v49 = vpop.f32.mrb[17].mxu0  ;;  %v1038_v60 = vadd.f32 %v1037_v40, %v948_v26 }
 0x363   :  { %v1040_v23 = vadd.f32 %v1039_v49, %v952_v47 }
 0x364   :  { %v1108_v51 = vpop.f32.mrb[14].mxu1 }
 0x365   :  { %v1109_v53 = vadd.f32 %v1108_v51, %v956_v46  ;;  %v1110_v54 = vpop.f32.mrb[15].mxu1 }
 0x366   :  { %v1111_v56 = vadd.f32 %v1110_v54, %v960_v50 }
 0x367   :  { %v1119_v57 = vmul.f32 %v1109_v53, %v1032_v52 }
 0x368   :  { %v1120_v58 = vmul.f32 %v1111_v56, %v1034_v55  ;;  %v1114_v59 = vpop.f32.mrb[16].mxu1 }
 0x369   :  { %v1115_v61 = vadd.f32 %v1114_v59, %v956_v46  ;;  %v1116_v27 = vpop.f32.mrb[17].mxu1  ;;  %1129 = vrot.lane.b32.xlu0 %v1119_v57, %s1448_s8  ;;  %v1125_v28 = vadd.f32 %v1119_v57, %v1650_v36 }
 0x36a   :  { %v1117_v63 = vadd.f32 %v1116_v27, %v960_v50  ;;  %1141 = vrot.lane.b32.xlu1 %v1120_v58, %s1448_s8 }
 0x36b   :  { %v1121_v62 = vmul.f32 %v1115_v61, %v1038_v60 }
 0x36c   :  { %v1122_v0 = vmul.f32 %v1117_v63, %v1040_v23 }
 0x36d   :  { %v1126_v1 = vadd.f32 %v1121_v62, %v1657_v48 }
 0x36e   :  { %1131 = vrot.lane.b32.xlu1 %v1121_v62, %s1448_s8 }
 0x372   :  { %1143 = vrot.lane.b32.xlu1 %v1122_v0, %s1448_s8 }
 0x3db   :  { %v1130_v2 = vpop.permute.xlu0 %1129 }
 0x3dc   :  { %v1135_v3 = vadd.f32 %v1130_v2, %v1125_v28  ;;  %v1142_v4 = vpop.permute.xlu1 %1141 }
 0x3de   :  { %v1137_v5 = vadd.f32 %v1135_v3, %v1120_v58 }
 0x3e0   :  { %v1147_v6 = vadd.f32 %v1142_v4, %v1137_v5  ;;  %v1132_v7 = vpop.permute.xlu1 %1131 }
 0x3e1   :  { %v1136_v8 = vadd.f32 %v1132_v7, %v1126_v1 }
 0x3e2   :  { %1150 = vst.msk [vmem:[#allocation10] sm:$0xff] %vm1149_vm2, %v1147_v6 }
 0x3e3   :  { %v1138_v36 = vadd.f32 %v1136_v8, %v1122_v0 }
 0x3e4   :  { %v1144_v9 = vpop.permute.xlu1 %1143 }
 0x3e5   :  { %v1148_v10 = vadd.f32 %v1144_v9, %v1138_v36 }
 0x3e7   :  { %1151 = vst.msk [vmem:[#allocation10 + $0x68] sm:$0xff] %vm1149_vm2, %v1148_v10 }
 0x3e8   :  { %1418 = shalt.err (!%p1415_p8)
}
 0x3e9   :  { %s1419_s30 = scalar_lea.hbm %s1704_s9, 3328 }
 0x3ea   :  { %p1420_p9 = scmp.ne.s32.totalorder %s1704_s9, %s1419_s30  ;;  %p1423_p10 = scmp.lt.u32.totalorder %s1419_s30, %s1704_s9 }
 0x3ec   :  { %p1425_p11 = pnand %p1423_p10, %p1420_p9 }
 0x3ee   :  { %1428 = shalt.err (!%p1425_p11)
}
 0x3ef   :  { %1163 = dma.vmem_to_hbm [thread:$0]  %s1158_s26, 3328, %s1704_s9, [#allocation4], %s1442_s0, %s1442_s0, %s1443_s12  }
 0x3f0   :  { %1435 = dma.done.wait [#allocation4], 3328  }
 0x3f1   :  { %1436 = vsyncadd [#allocation4], 4294963968 }
 0x3f2   :  { %1167 = vsyncpa [#allocation3], 1 }
 0x3f3   :  { %1168 = vsyncpa [#allocation6], 1 }
 0x3f4   :  { %1169 = vsyncpa [#allocation9], 1 }
 0x3f5   :  { %1170 = vsyncpa [#allocation4], 1 }

</bundles_post_ra>
